<compile_context>
chip_gen: v7x
topology: tpu7x:2x2x1
jax: 0.10.0
libtpu: 0.0.40
codegen_flags: <defaults>
</compile_context>

<pallas_src>
import jax
import jax.numpy as jnp
from jax.experimental import pallas as pl
from jax.experimental.pallas import tpu as pltpu


def linear_softmax_kernel(x_ref, w_ref, o_ref):
    # x_ref: (tile_b, K), w_ref: (K, OUT), o_ref: (tile_b, OUT)
    logits = jnp.dot(x_ref[...], w_ref[...], preferred_element_type=jnp.float32)
    # Numerically-stable softmax over the feature axis (PyTorch dim=1).
    m = jnp.max(logits, axis=-1, keepdims=True)
    e = jnp.exp(logits - m)
    denom = jnp.sum(e, axis=-1, keepdims=True)
    # Exact divide: every compute unit has huge slack here, and downstream code
    # may assume rows sum to exactly 1.
    o_ref[...] = (e / denom).astype(o_ref.dtype)


def network_forward(x, w, *, tile_b=None):
    """x: [B, K] f32, w: [OUT, K] f32 (PyTorch Linear layout).

    Returns softmax(x @ w.T, axis=1) with shape [B, OUT].
    """
    B, K = x.shape
    OUT = w.shape[0]

    # One-time, tiny (4x300) transpose in the wrapper so the kernel contracts
    # with a plain row-major dot; the weight block is resident across the grid.
    w_t = jnp.transpose(w)  # (K, OUT)

    # Batch tile: multiple of 8 sublanes. 512 rows amortizes per-step pipeline
    # overhead well; for small B, a single right-sized tile avoids any padding
    # work (the last partial block is masked by Pallas anyway).
    if tile_b is None:
        tile_b = min(512, max(8, pl.cdiv(B, 8) * 8))

    grid = (pl.cdiv(B, tile_b),)

    cost = pl.CostEstimate(
        flops=2 * B * K * OUT,
        transcendentals=B * OUT,
        bytes_accessed=(B * K + K * OUT + B * OUT) * 4,
    )

    return pl.pallas_call(
        linear_softmax_kernel,
        out_shape=jax.ShapeDtypeStruct((B, OUT), jnp.float32),
        grid=grid,
        in_specs=[
            # x: tile over batch, full (unpadded) K — legal since K equals the
            # full array dim; no wrapper pad pass over x.
            pl.BlockSpec((tile_b, K), lambda i: (i, 0)),
            # w_t: full weight, same block every step (resident).
            pl.BlockSpec((K, OUT), lambda i: (0, 0)),
        ],
        out_specs=pl.BlockSpec((tile_b, OUT), lambda i: (i, 0)),
        compiler_params=pltpu.CompilerParams(
            dimension_semantics=("parallel",),
        ),
        cost_estimate=cost,
    )(x, w_t)


if __name__ == "__main__":
    key = jax.random.PRNGKey(0)
    kx, kw = jax.random.split(key)

    B, IN, OUT = 8, 300, 4
    x = jax.random.normal(kx, (B, IN), dtype=jnp.float32)
    # deterministic weight init mimicking nn.Linear's uniform(-1/sqrt(fan_in), 1/sqrt(fan_in))
    bound = 1.0 / (IN ** 0.5)
    w = jax.random.uniform(kw, (OUT, IN), dtype=jnp.float32, minval=-bound, maxval=bound)

    out = network_forward(x, w)
    jax.block_until_ready(out)

    # sanity check against plain-JAX reference
    ref = jax.nn.softmax(x @ w.T, axis=1)
    assert out.shape == (B, OUT)
    assert jnp.allclose(out, ref, atol=1e-3, rtol=1e-3), "mismatch vs reference"

    print("KERNEL_OK")
</pallas_src>

<mosaic_0001>
module attributes {stable_mosaic.version = 11 : i64} {
  func.func @linear_softmax_kernel(%arg0: i32, %arg1: memref<8x300xf32, #tpu.memory_space<vmem>>, %arg2: memref<300x4xf32, #tpu.memory_space<vmem>>, %arg3: memref<8x4xf32, #tpu.memory_space<vmem>>) attributes {dimension_semantics = [#tpu.dimension_semantics<parallel>], iteration_bounds = array<i64: 1>, scalar_prefetch = 0 : i64, scratch_operands = 0 : i64, tpu.core_type = #tpu.core_type<tc>, window_params = [{transform_indices = @transform_0, window_bounds = array<i64: 8, 300>}, {pipeline_mode = #tpu.pipeline_mode<synchronous>, transform_indices = @transform_1, window_bounds = array<i64: 300, 4>}, {transform_indices = @transform_2, window_bounds = array<i64: 8, 4>}]} {
    %c0 = arith.constant 0 : index
    %c0_0 = arith.constant 0 : index
    %0 = vector.load %arg1[%c0, %c0_0] : memref<8x300xf32, #tpu.memory_space<vmem>>, vector<8x300xf32>
    %c0_1 = arith.constant 0 : index
    %c0_2 = arith.constant 0 : index
    %1 = vector.load %arg2[%c0_1, %c0_2] : memref<300x4xf32, #tpu.memory_space<vmem>>, vector<300x4xf32>
    %cst = arith.constant dense<0.000000e+00> : vector<8x4xf32>
    %2 = tpu.matmul %0, %1, %cst {dimension_numbers = #tpu.dot_dimension_numbers<[1], [0], [0], [1], [0, 0, 1, 1], [], []>} : vector<8x300xf32>, vector<300x4xf32>, vector<8x4xf32> -> vector<8x4xf32>
    %cst_3 = arith.constant dense<0xFF800000> : vector<8xf32>
    %3 = vector.multi_reduction <maximumf>, %2, %cst_3 [1] : vector<8x4xf32> to vector<8xf32>
    %4 = vector.shape_cast %3 : vector<8xf32> to vector<8x1xf32>
    %5 = vector.broadcast %4 : vector<8x1xf32> to vector<8x4xf32>
    %6 = arith.subf %2, %5 : vector<8x4xf32>
    %7 = math.exp %6 : vector<8x4xf32>
    %cst_4 = arith.constant dense<0.000000e+00> : vector<8xf32>
    %8 = vector.multi_reduction <add>, %7, %cst_4 [1] : vector<8x4xf32> to vector<8xf32>
    %9 = vector.shape_cast %8 : vector<8xf32> to vector<8x1xf32>
    %10 = vector.broadcast %9 : vector<8x1xf32> to vector<8x4xf32>
    %11 = arith.divf %7, %10 : vector<8x4xf32>
    %c0_5 = arith.constant 0 : index
    %c0_6 = arith.constant 0 : index
    %12 = vector.load %arg3[%c0_5, %c0_6] : memref<8x4xf32, #tpu.memory_space<vmem>>, vector<8x4xf32>
    tpu.vector_store %arg3[%c0_5, %c0_6], %11 {strides = array<i32>} : memref<8x4xf32, #tpu.memory_space<vmem>>, vector<8x4xf32>,
    return
  }
  func.func @transform_0(%arg0: i32) -> (i32, i32) {
    %c0_i32 = arith.constant 0 : i32
    %c0_i32_0 = arith.constant 0 : i32
    return %arg0, %c0_i32 : i32, i32
  }
  func.func @transform_1(%arg0: i32) -> (i32, i32) {
    %c0_i32 = arith.constant 0 : i32
    %c0_i32_0 = arith.constant 0 : i32
    %c0_i32_1 = arith.constant 0 : i32
    return %c0_i32, %c0_i32_0 : i32, i32
  }
  func.func @transform_2(%arg0: i32) -> (i32, i32) {
    %c0_i32 = arith.constant 0 : i32
    %c0_i32_0 = arith.constant 0 : i32
    return %arg0, %c0_i32 : i32, i32
  }
}

</mosaic_0001>

<bundles_post_ra>
// kernel: tpu_custom_call.1
= control target key start
LH: loop header
LB: loop body
LE: loop exit
PB: predicated region body
PF: predicated region fallthrough
CT: control target
= control target key end

     0   :  { %v326_v3 = vmov 0.0|0.0   ;;  %vm327_vm0 = vmmov 0   ;;  %v328_v8 = vmov 0.0   ;;  %vm56_vm1 = vcmask 1043456   ;;  %s474_s1 = inlined_call_operand.vmem [shape: f32[300,4], index: 1, kind: input, shape index: {}]   ;;  %s475_s0 = inlined_call_operand.vmem [shape: f32[8,300], index: 0, kind: input, shape index: {}]   ;;  %s476_s2 = inlined_call_operand.vmem [shape: f32[8,4], index: 2, kind: output, shape index: {}]  }
   0x1   :  { %v30_v0 = vld [vmem:[%s474_s1 + $0x80] sm:$0xff]  ;;  %v31_v1 = vld [vmem:[%s474_s1 + $0x88] sm:$0xff]  ;;  %308 = vmatprep.subr.bf16.mxu1 %v326_v3  ;;  %v32_v6 = vld [vmem:[%s474_s1 + $0x90] sm:$0xff]  ;;  %273 = vmatprep.mubr.msk.f32.mxu1 %vm327_vm0, %v328_v8  ;;  %vm329_vm2 = vmmov 1   ;;  %vm52_vm4 = vcmask 359424   ;;  %vm200_vm5 = vcmask 31744  }
   0x2   :  { %v14_v2 = vld [vmem:[%s474_s1] sm:$0xff]  ;;  %v276_v4 = vpack.c.bf16 %v31_v1, %v30_v0  ;;  %v15_v5 = vld [vmem:[%s474_s1 + $0x8] sm:$0xff]  ;;  %v33_v7 = vld [vmem:[%s474_s1 + $0x98] sm:$0xff] }
   0x3   :  { %v278_v9 = vpack.c.bf16 %v15_v5, %v14_v2  ;;  %v280_v10 = vpack.c.bf16 %v33_v7, %v32_v6  ;;  %v16_v11 = vld [vmem:[%s474_s1 + $0x10] sm:$0xff]  ;;  %v17_v12 = vld [vmem:[%s474_s1 + $0x18] sm:$0xff]  ;;  %v34_v13 = vld [vmem:[%s474_s1 + $0xa0] sm:$0xff] }
   0x4   :  { %277 = vmatprep.subr.bf16.mxu0 %v276_v4  ;;  %v35_v14 = vld [vmem:[%s474_s1 + $0xa8] sm:$0xff]  ;;  %v282_v15 = vpack.c.bf16 %v17_v12, %v16_v11  ;;  %v18_v17 = vld [vmem:[%s474_s1 + $0x20] sm:$0xff]  ;;  %v36_v19 = vld [vmem:[%s474_s1 + $0xb0] sm:$0xff] }
   0x5   :  { %279 = vmatpush3.bf16.msra.mxu0 %v278_v9  ;;  %v284_v16 = vpack.c.bf16 %v35_v14, %v34_v13  ;;  %v19_v18 = vld [vmem:[%s474_s1 + $0x28] sm:$0xff]  ;;  %v37_v20 = vld [vmem:[%s474_s1 + $0xb8] sm:$0xff]  ;;  %v46_v22 = vld [vmem:[%s474_s1 + $0x100] sm:$0xff] }
   0x6   :  { %281 = vmatprep.subr.bf16.mxu0 %v280_v10  ;;  %v286_v21 = vpack.c.bf16 %v19_v18, %v18_v17  ;;  %v47_v23 = vld [vmem:[%s474_s1 + $0x108] sm:$0xff]  ;;  %v288_v24 = vpack.c.bf16 %v37_v20, %v36_v19  ;;  %v20_v25 = vld [vmem:[%s474_s1 + $0x30] sm:$0xff]  ;;  %v21_v26 = vld [vmem:[%s474_s1 + $0x38] sm:$0xff] }
   0x7   :  { %v38_v27 = vld [vmem:[%s474_s1 + $0xc0] sm:$0xff]  ;;  %v309_v28 = vpack.c.bf16 %v47_v23, %v46_v22  ;;  %v39_v29 = vld [vmem:[%s474_s1 + $0xc8] sm:$0xff]  ;;  %v48_v30 = vld [vmem:[%s474_s1 + $0x110] sm:$0xff]  ;;  %v290_v33 = vpack.c.bf16 %v21_v26, %v20_v25 }
   0x8   :  { %v49_v31 = vld [vmem:[%s474_s1 + $0x118] sm:$0xff]  ;;  %v12_v34 = vld [vmem:[%s475_s0 + $0x8] sm:$0xff]  ;;  %v50_v35 = vld [vmem:[%s474_s1 + $0x120] sm:$0xff]  ;;  %v292_v37 = vpack.c.bf16 %v39_v29, %v38_v27 }
   0x9   :  { %283 = vmatpush3.bf16.msra.mxu0 %v282_v15  ;;  %310 = vmatpush3.bf16.msra.mxu1 %v309_v28  ;;  %v312_v32 = vpack.c.bf16 %v49_v31, %v48_v30  ;;  %v51_v36 = vld [vmem:[%s474_s1 + $0x128] sm:$0xf]  ;;  %v22_v38 = vld [vmem:[%s474_s1 + $0x40] sm:$0xff]  ;;  %v40_v40 = vld [vmem:[%s474_s1 + $0xd0] sm:$0xff] }
   0xa   :  { %285 = vmatprep.subr.bf16.mxu0 %v284_v16  ;;  %311 = vmatprep.subr.bf16.mxu1 %v326_v3  ;;  %v23_v39 = vld [vmem:[%s474_s1 + $0x48] sm:$0xff]  ;;  %v41_v41 = vld [vmem:[%s474_s1 + $0xd8] sm:$0xff]  ;;  %v315_v42 = vpack.c.bf16 %v51_v36, %v50_v35  ;;  %vm316_vm3 = vmpackc.low %vm56_vm1, %vm329_vm2 }
   0xb   :  { %124 = vmatprep.mubr.f32.mxu0 %v12_v34  ;;  %v294_v43 = vpack.c.bf16 %v23_v39, %v22_v38  ;;  %v296_v44 = vpack.c.bf16 %v41_v41, %v40_v40  ;;  %v24_v45 = vld [vmem:[%s474_s1 + $0x50] sm:$0xff]  ;;  %v25_v46 = vld [vmem:[%s474_s1 + $0x58] sm:$0xff]  ;;  %v42_v47 = vld [vmem:[%s474_s1 + $0xe0] sm:$0xff] }
   0xc   :  { %v43_v48 = vld [vmem:[%s474_s1 + $0xe8] sm:$0xff]  ;;  %v13_v49 = vld [vmem:[%s475_s0 + $0x10] sm:$0xff]  ;;  %v298_v50 = vpack.c.bf16 %v25_v46, %v24_v45  ;;  %v26_v52 = vld [vmem:[%s474_s1 + $0x60] sm:$0xff] }
   0xd   :  { %287 = vmatpush3.bf16.msra.mxu0 %v286_v21  ;;  %313 = vmatpush3.bf16.msra.mxu1 %v312_v32  ;;  %v300_v51 = vpack.c.bf16 %v43_v48, %v42_v47  ;;  %v27_v53 = vld [vmem:[%s474_s1 + $0x68] sm:$0xff]  ;;  %v44_v54 = vld [vmem:[%s474_s1 + $0xf0] sm:$0xff]  ;;  %v45_v55 = vld [vmem:[%s474_s1 + $0xf8] sm:$0xff] }
   0xe   :  { %289 = vmatprep.subr.bf16.mxu0 %v288_v24  ;;  %314 = vmatprep.subr.bf16.mxu1 %v326_v3  ;;  %v302_v56 = vpack.c.bf16 %v27_v53, %v26_v52  ;;  %v304_v57 = vpack.c.bf16 %v45_v55, %v44_v54  ;;  %v28_v58 = vld [vmem:[%s474_s1 + $0x70] sm:$0xff]  ;;  %v29_v59 = vld [vmem:[%s474_s1 + $0x78] sm:$0xff]  ;;  %v11_v61 = vld [vmem:[%s475_s0] sm:$0xff] }
   0xf   :  { %v306_v60 = vpack.c.bf16 %v29_v59, %v28_v58 }
  0x11   :  { %291 = vmatpush3.bf16.msra.mxu0 %v290_v33  ;;  %317 = vmatpush3.bf16.msk.msra.mxu1 %vm316_vm3, %v315_v42 }
  0x12   :  { %293 = vmatprep.subr.bf16.mxu0 %v292_v37 }
  0x14   :  { %274 = vmatmul.mubr.msk.f32.vlgmr.msra.gmra.mrb[0].mxu1 %vm52_vm4, %v13_v49 }
  0x15   :  { %295 = vmatpush3.bf16.msra.mxu0 %v294_v43 }
  0x16   :  { %297 = vmatprep.subr.bf16.mxu0 %v296_v44 }
  0x19   :  { %299 = vmatpush3.bf16.msra.mxu0 %v298_v50 }
  0x1a   :  { %301 = vmatprep.subr.bf16.mxu0 %v300_v51 }
  0x1d   :  { %303 = vmatpush3.bf16.msra.mxu0 %v302_v56 }
  0x1e   :  { %305 = vmatprep.subr.bf16.mxu0 %v304_v57 }
  0x21   :  { %307 = vmatpush3.bf16.msra.mxu0 %v306_v60 }
  0x24   :  { %125 = vmatmul.mubr.f32.vlgmr.msra.gmra.mrb[0].mxu0 %v11_v61 }
  0xe7   :  { %v196_v62 = vpop.f32.mrb[0].mxu1 }
  0xe8   :  { %v275_v63 = vpop.f32.mrb[1].mxu1 }
  0xf7   :  { %v251_v0 = vpop.f32.mrb[0].mxu0 }
  0xf8   :  { %v252_v1 = vpop.f32.mrb[1].mxu0 }
  0xf9   :  { %v253_v2 = vadd.f32 %v252_v1, %v251_v0 }
  0xfb   :  { %v197_v3 = vadd.f32 %v253_v2, %v196_v62 }
  0xfd   :  { %v201_v4 = vsel %vm200_vm5, %v197_v3, -inf }
  0xfe   :  { %202 = vmax.xlane.f32.xlu0 %v201_v4 }
 0x18b   :  { %v203_v5 = vpop.xlane.xlu0 %202 }
 0x18c   :  { %v204_v6 = vsub.f32 %v197_v3, %v203_v5 }
 0x18e   :  { %v205_v7 = vmul.f32 1.442695, %v204_v6 }
 0x190   :  { %322 = vpow2.f32 %v205_v7 }
 0x19a   :  { %v323_v8 = vpop.eup %322 }
 0x19b   :  { %v207_v9 = vsel %vm200_vm5, %v323_v8, 0.0 }
 0x19c   :  { %208 = vadd.xlane.f32.xlu0 %v207_v9 }
 0x229   :  { %v209_v10 = vpop.xlane.xlu0 %208 }
 0x22a   :  { %324 = vrcp.f32 %v209_v10 }
 0x234   :  { %v325_v11 = vpop.eup %324 }
 0x235   :  { %v211_v12 = vmul.f32 %v325_v11, %v323_v8 }
 0x237   :  { %212 = vst.msk [vmem:[%s476_s2] sm:$0xff] %vm200_vm5, %v211_v12 }

</bundles_post_ra>
